<compile_context>
chip_gen: v7x
topology: tpu7x:2x2x1
jax: 0.10.0
libtpu: 0.0.40
codegen_flags: <defaults>
</compile_context>

<pallas_src>
import jax
import jax.numpy as jnp
import numpy as np
from jax.experimental import pallas as pl
from jax.experimental.pallas import tpu as pltpu  # noqa: F401  (TPU backend assumed)

# ----- small synthetic config (mirrors the module's __init__ shapes) -----
B = 2            # batch
S = 8            # text sequence length
H = 32           # config.hidden_size
P = 4            # config.prefix_length
V = 16           # config.vision_dim
NH = 4           # config.num_heads
HD = H // NH     # head dim
VOCAB = 50

SLAB_ROWS = 288  # packed constant slab: [288, 128] f32 (~144 KiB VMEM)

# Slab row offsets (all 8-aligned; lane widths <= 128).
_R_EXP, _R_MASK, _R_WD, _R_BD = 0, 8, 16, 80
_R_WQ, _R_BQ, _R_WK, _R_WVO, _R_BO = 88, 120, 128, 160, 192
_R_WGT, _R_WGA, _R_BG, _R_NEG = 200, 232, 264, 272


def fusion_kernel(text_ref, img_ref, slab_ref, out_ref):
    text = text_ref[...]                                   # [B*S, H]
    img = img_ref[...]                                     # [B, V]

    # --- static slices of the packed constant slab (free). -----------------
    exp_mat = slab_ref[_R_EXP:_R_EXP + B * P, :B]          # [B*P, B]   one-hot row->batch
    mask_blk = slab_ref[_R_MASK:_R_MASK + B * P, :P * V]   # [B*P, P*V] 0/1 block mask
    wd_blk = slab_ref[_R_WD:_R_WD + P * V, :H]             # [P*V, H]
    bd_rows = slab_ref[_R_BD:_R_BD + B * P, :H]            # [B*P, H]
    wq = slab_ref[_R_WQ:_R_WQ + H, :H]                     # [H, H]
    bq = slab_ref[_R_BQ:_R_BQ + 1, :H]                     # [1, H]
    wk = slab_ref[_R_WK:_R_WK + H, :H]                     # [H, H]
    wvo = slab_ref[_R_WVO:_R_WVO + H, :]                   # [H, NH*H]  (wo folded into wv)
    bo = slab_ref[_R_BO:_R_BO + 1, :H]                     # [1, H]     (bo + bv @ wo)
    wg_t = slab_ref[_R_WGT:_R_WGT + H, :H]                 # [H, H]     gate weight, text half
    wg_a = slab_ref[_R_WGA:_R_WGA + H, :H]                 # [H, H]     gate weight, attn half
    bg = slab_ref[_R_BG:_R_BG + 1, :H]                     # [1, H]
    neg = slab_ref[_R_NEG:_R_NEG + B * S, :B * P]          # [B*S, B*P] block-diag additive mask

    # --- dense_layer: block-diagonal LHS built in-kernel (one-hot matmul + lane
    #     concat + mask), then one matmul + bias + ReLU -> vision rows [B*P, H].
    img_tiled = jnp.concatenate([img] * P, axis=1)                         # [B, P*V]
    lhs = jnp.dot(exp_mat, img_tiled,
                  preferred_element_type=jnp.float32) * mask_blk           # [B*P, P*V]
    vis = jnp.maximum(
        jnp.dot(lhs, wd_blk, preferred_element_type=jnp.float32) + bd_rows, 0.0)  # [B*P, H]

    # --- projections.  bk is dropped (softmax-invariant); wo/bv folded into wvo/bo.
    q = jnp.dot(text, wq, preferred_element_type=jnp.float32) + bq         # [B*S, H]
    k = jnp.dot(vis, wk, preferred_element_type=jnp.float32)               # [B*P, H]
    vp = jnp.dot(vis, wvo, preferred_element_type=jnp.float32)             # [B*P, NH*H]

    scale = 1.0 / float(np.sqrt(HD))

    # --- multi-head attention: per head softmax over own-batch keys (block-diag
    #     additive mask), per-head output directly accumulated into one f32
    #     accumulator seeded with the folded output bias (MRB-friendly on v7x).
    attn = jnp.broadcast_to(bo, (B * S, H))
    for h in range(NH):
        hs = slice(h * HD, (h + 1) * HD)
        qh = q[:, hs]                                                      # [B*S, HD]
        kh = k[:, hs]                                                      # [B*P, HD]
        s = jax.lax.dot_general(qh, kh, (((1,), (1,)), ((), ())),
                                preferred_element_type=jnp.float32) * scale + neg
        s = s - jnp.max(s, axis=-1, keepdims=True)
        e = jnp.exp(s)
        a = e * pl.reciprocal(jnp.sum(e, axis=-1, keepdims=True), approx=True)
        attn = attn + jnp.dot(a, vp[:, h * H:(h + 1) * H],
                              preferred_element_type=jnp.float32)          # [B*S, H]

    # --- gate_dense on [text, attn] without the lane concat: split weight halves.
    gate = jax.nn.sigmoid(
        jnp.dot(text, wg_t, preferred_element_type=jnp.float32)
        + jnp.dot(attn, wg_a, preferred_element_type=jnp.float32) + bg)
    out_ref[...] = (1.0 - gate) * text + gate * attn


def prepare_params(params):
    """One-time weight preprocessing: fold wo/bv/bk, re-block wd, precompute the
    attention / block masks, and pack everything into one [288, 128] f32 slab."""
    (wd, bd, wq, bq, wk, bk, wv, bv, wo, bo, wg, bg) = [
        np.asarray(p, np.float32) for p in params]

    # dense_layer weight re-blocked for the block-diagonal LHS:
    #   wd_blk[p*V + v, j] = wd[v, p*H + j]
    wd_blk = wd.T.reshape(P, H, V).transpose(0, 2, 1).reshape(P * V, H)
    bd_rows = np.tile(bd.reshape(P, H), (B, 1))                            # [B*P, H]

    # Fold the output projection into the value projection (per head), and the
    # value bias through wo into the output bias (softmax rows sum to 1).
    wvo = np.concatenate(
        [wv[:, h * HD:(h + 1) * HD] @ wo[h * HD:(h + 1) * HD, :] for h in range(NH)],
        axis=1)                                                            # [H, NH*H]
    bo_fold = bo + bv @ wo                                                 # [1, H]
    # bk is dropped entirely: a constant added to every key shifts each score row
    # by a per-row constant, which softmax ignores.

    # One-hot batch-expansion matrix and 0/1 block mask for the in-kernel
    # block-diagonal LHS (row order r = b*P + p).
    exp_mat = np.zeros((B * P, B), np.float32)
    exp_mat[np.arange(B * P), np.arange(B * P) // P] = 1.0
    mask_blk = np.zeros((B * P, P * V), np.float32)
    for p in range(P):
        mask_blk[np.arange(B) * P + p, p * V:(p + 1) * V] = 1.0

    # Block-diagonal additive attention mask (query batch == key batch -> 0).
    qb = np.arange(B * S)[:, None] // S
    kb = np.arange(B * P)[None, :] // P
    neg = np.where(qb == kb, 0.0, -1e30).astype(np.float32)               # [B*S, B*P]

    slab = np.zeros((SLAB_ROWS, 128), np.float32)

    def put(r, a):
        slab[r:r + a.shape[0], :a.shape[1]] = a

    put(_R_EXP, exp_mat)
    put(_R_MASK, mask_blk)
    put(_R_WD, wd_blk)
    put(_R_BD, bd_rows)
    put(_R_WQ, wq)
    put(_R_BQ, bq)
    put(_R_WK, wk)
    put(_R_WVO, wvo)
    put(_R_BO, bo_fold)
    put(_R_WGT, wg[:H, :])
    put(_R_WGA, wg[H:, :])
    put(_R_BG, bg)
    put(_R_NEG, neg)
    return jnp.asarray(slab)


@jax.jit
def forward(input_ids, emb_table, image_prefix, slab):
    """Jitted forward glue: embedding lookup (T5 encoder stand-in) + fused kernel."""
    # TODO(synk): stand-in for MultimodalEncoder / T5EncoderModel.last_hidden_state.
    text_features = emb_table[input_ids]                                   # [B, S, H]
    text2d = text_features.reshape(B * S, H)                              # leading-dim reshape (free)

    # No grid: the whole (tiny) problem is one invocation; every array is a
    # whole-array VMEM block (~160 KiB total, far under every gen's VMEM).
    # At production shapes (H>=768, long S) this would instead use a row grid
    # over B*S with dimension_semantics=("parallel",) and bf16 matmul operands.
    out2d = pl.pallas_call(
        fusion_kernel,
        out_shape=jax.ShapeDtypeStruct((B * S, H), jnp.float32),
    )(text2d, image_prefix, slab)
    return out2d.reshape(B, S, H)


def reference(text, img, params):
    """Pure-JAX reference of the same math (for a correctness sanity check)."""
    (wd, bd, wq, bq, wk, bk, wv, bv, wo, bo, wg, bg) = params
    vis = jnp.maximum(img @ wd + bd, 0.0).reshape(B, P, H)
    q = text @ wq + bq
    k = vis @ wk + bk
    v = vis @ wv + bv
    qh = q.reshape(B, S, NH, HD).transpose(0, 2, 1, 3)
    kh = k.reshape(B, P, NH, HD).transpose(0, 2, 1, 3)
    vh = v.reshape(B, P, NH, HD).transpose(0, 2, 1, 3)
    s = jnp.einsum('bnqd,bnkd->bnqk', qh, kh) / np.sqrt(HD)
    a = jax.nn.softmax(s, axis=-1)
    ctx = jnp.einsum('bnqk,bnkd->bnqd', a, vh).transpose(0, 2, 1, 3).reshape(B, S, H)
    attn_out = ctx @ wo + bo
    merge = jnp.concatenate([text, attn_out], axis=-1)
    gate = jax.nn.sigmoid(merge @ wg + bg)
    return (1.0 - gate) * text + gate * attn_out


if __name__ == "__main__":
    key = jax.random.PRNGKey(0)
    keys = jax.random.split(key, 16)

    def init(k, shape, scale=0.1):
        return scale * jax.random.normal(k, shape, dtype=jnp.float32)

    # Deterministic parameter init (pre-transposed [in, out] weight layout).
    wd = init(keys[0], (V, P * H));   bd = init(keys[1], (1, P * H))
    wq = init(keys[2], (H, H));       bq = init(keys[3], (1, H))
    wk = init(keys[4], (H, H));       bk = init(keys[5], (1, H))
    wv = init(keys[6], (H, H));       bv = init(keys[7], (1, H))
    wo = init(keys[8], (H, H));       bo = init(keys[9], (1, H))
    wg = init(keys[10], (2 * H, H));  bg = init(keys[11], (1, H))
    params = (wd, bd, wq, bq, wk, bk, wv, bv, wo, bo, wg, bg)
    slab = prepare_params(params)

    # Inputs. TODO(synk): input_ids/emb_table stand in for the T5EncoderModel path.
    input_ids = jax.random.randint(keys[12], (B, S), 0, VOCAB)
    emb_table = init(keys[13], (VOCAB, H), scale=1.0)
    image_prefix = init(keys[14], (B, V), scale=1.0)                      # [B, V]

    out = forward(input_ids, emb_table, image_prefix, slab)
    out = jax.block_until_ready(out)

    text_features = emb_table[input_ids]                                  # same lookup as in forward()
    ref = reference(text_features, image_prefix, params)
    np.testing.assert_allclose(np.asarray(out), np.asarray(ref), rtol=2e-2, atol=2e-2)

    print("KERNEL_OK")
</pallas_src>

<mosaic_0001>
module attributes {stable_mosaic.version = 11 : i64} {
  func.func @fusion_kernel(%arg0: memref<16x32xf32, #tpu.memory_space<vmem>>, %arg1: memref<2x16xf32, #tpu.memory_space<vmem>>, %arg2: memref<288x128xf32, #tpu.memory_space<vmem>>, %arg3: memref<16x32xf32, #tpu.memory_space<vmem>>) attributes {dimension_semantics = [], scalar_prefetch = 0 : i64, scratch_operands = 0 : i64, tpu.core_type = #tpu.core_type<tc>} {
    %c0 = arith.constant 0 : index
    %c0_0 = arith.constant 0 : index
    %0 = vector.load %arg0[%c0, %c0_0] : memref<16x32xf32, #tpu.memory_space<vmem>>, vector<16x32xf32>
    %c0_1 = arith.constant 0 : index
    %c0_2 = arith.constant 0 : index
    %1 = vector.load %arg1[%c0_1, %c0_2] : memref<2x16xf32, #tpu.memory_space<vmem>>, vector<2x16xf32>
    %c0_3 = arith.constant 0 : index
    %c0_4 = arith.constant 0 : index
    %2 = vector.load %arg2[%c0_3, %c0_4] : memref<288x128xf32, #tpu.memory_space<vmem>>, vector<8x2xf32>
    %c8 = arith.constant 8 : index
    %c0_5 = arith.constant 0 : index
    %3 = vector.load %arg2[%c8, %c0_5] : memref<288x128xf32, #tpu.memory_space<vmem>>, vector<8x64xf32>
    %c16 = arith.constant 16 : index
    %c0_6 = arith.constant 0 : index
    %4 = vector.load %arg2[%c16, %c0_6] : memref<288x128xf32, #tpu.memory_space<vmem>>, vector<64x32xf32>
    %c80 = arith.constant 80 : index
    %c0_7 = arith.constant 0 : index
    %5 = vector.load %arg2[%c80, %c0_7] : memref<288x128xf32, #tpu.memory_space<vmem>>, vector<8x32xf32>
    %c88 = arith.constant 88 : index
    %c0_8 = arith.constant 0 : index
    %6 = vector.load %arg2[%c88, %c0_8] : memref<288x128xf32, #tpu.memory_space<vmem>>, vector<32x32xf32>
    %c120 = arith.constant 120 : index
    %c0_9 = arith.constant 0 : index
    %7 = vector.load %arg2[%c120, %c0_9] : memref<288x128xf32, #tpu.memory_space<vmem>>, vector<1x32xf32>
    %c128 = arith.constant 128 : index
    %c0_10 = arith.constant 0 : index
    %8 = vector.load %arg2[%c128, %c0_10] : memref<288x128xf32, #tpu.memory_space<vmem>>, vector<32x32xf32>
    %c160 = arith.constant 160 : index
    %c0_11 = arith.constant 0 : index
    %9 = vector.load %arg2[%c160, %c0_11] : memref<288x128xf32, #tpu.memory_space<vmem>>, vector<32x128xf32>
    %c192 = arith.constant 192 : index
    %c0_12 = arith.constant 0 : index
    %10 = vector.load %arg2[%c192, %c0_12] : memref<288x128xf32, #tpu.memory_space<vmem>>, vector<1x32xf32>
    %c200 = arith.constant 200 : index
    %c0_13 = arith.constant 0 : index
    %11 = vector.load %arg2[%c200, %c0_13] : memref<288x128xf32, #tpu.memory_space<vmem>>, vector<32x32xf32>
    %c232 = arith.constant 232 : index
    %c0_14 = arith.constant 0 : index
    %12 = vector.load %arg2[%c232, %c0_14] : memref<288x128xf32, #tpu.memory_space<vmem>>, vector<32x32xf32>
    %c264 = arith.constant 264 : index
    %c0_15 = arith.constant 0 : index
    %13 = vector.load %arg2[%c264, %c0_15] : memref<288x128xf32, #tpu.memory_space<vmem>>, vector<1x32xf32>
    %c272 = arith.constant 272 : index
    %c0_16 = arith.constant 0 : index
    %14 = vector.load %arg2[%c272, %c0_16] : memref<288x128xf32, #tpu.memory_space<vmem>>, vector<16x8xf32>
    %15 = tpu.concatenate %1, %1, %1, %1 in 1 : vector<2x16xf32>, vector<2x16xf32>, vector<2x16xf32>, vector<2x16xf32> -> vector<2x64xf32>
    %cst = arith.constant dense<0.000000e+00> : vector<8x64xf32>
    %16 = tpu.matmul %2, %15, %cst {dimension_numbers = #tpu.dot_dimension_numbers<[1], [0], [0], [1], [0, 0, 1, 1], [], []>} : vector<8x2xf32>, vector<2x64xf32>, vector<8x64xf32> -> vector<8x64xf32>
    %17 = arith.mulf %16, %3 : vector<8x64xf32>
    %cst_17 = arith.constant dense<0.000000e+00> : vector<8x32xf32>
    %18 = tpu.matmul %17, %4, %cst_17 {dimension_numbers = #tpu.dot_dimension_numbers<[1], [0], [0], [1], [0, 0, 1, 1], [], []>} : vector<8x64xf32>, vector<64x32xf32>, vector<8x32xf32> -> vector<8x32xf32>
    %19 = arith.addf %18, %5 : vector<8x32xf32>
    %cst_18 = arith.constant 0.000000e+00 : f32
    %20 = vector.broadcast %cst_18 : f32 to vector<8x32xf32>
    %21 = arith.maximumf %19, %20 : vector<8x32xf32>
    %cst_19 = arith.constant dense<0.000000e+00> : vector<16x32xf32>
    %22 = tpu.matmul %0, %6, %cst_19 {dimension_numbers = #tpu.dot_dimension_numbers<[1], [0], [0], [1], [0, 0, 1, 1], [], []>} : vector<16x32xf32>, vector<32x32xf32>, vector<16x32xf32> -> vector<16x32xf32>
    %23 = vector.broadcast %7 : vector<1x32xf32> to vector<16x32xf32>
    %24 = arith.addf %22, %23 : vector<16x32xf32>
    %cst_20 = arith.constant dense<0.000000e+00> : vector<8x32xf32>
    %25 = tpu.matmul %21, %8, %cst_20 {dimension_numbers = #tpu.dot_dimension_numbers<[1], [0], [0], [1], [0, 0, 1, 1], [], []>} : vector<8x32xf32>, vector<32x32xf32>, vector<8x32xf32> -> vector<8x32xf32>
    %cst_21 = arith.constant dense<0.000000e+00> : vector<8x128xf32>
    %26 = tpu.matmul %21, %9, %cst_21 {dimension_numbers = #tpu.dot_dimension_numbers<[1], [0], [0], [1], [0, 0, 1, 1], [], []>} : vector<8x32xf32>, vector<32x128xf32>, vector<8x128xf32> -> vector<8x128xf32>
    %27 = vector.shape_cast %10 : vector<1x32xf32> to vector<1x32xf32>
    %28 = vector.broadcast %27 : vector<1x32xf32> to vector<16x32xf32>
    %29 = vector.extract_strided_slice %24 {offsets = [0, 0], sizes = [16, 8], strides = [1, 1]} : vector<16x32xf32> to vector<16x8xf32>
    %30 = vector.extract_strided_slice %25 {offsets = [0, 0], sizes = [8, 8], strides = [1, 1]} : vector<8x32xf32> to vector<8x8xf32>
    %cst_22 = arith.constant dense<0.000000e+00> : vector<16x8xf32>
    %31 = tpu.matmul %29, %30, %cst_22 {dimension_numbers = #tpu.dot_dimension_numbers<[1], [1], [0], [0], [0, 0, 1, 0], [], []>} : vector<16x8xf32>, vector<8x8xf32>, vector<16x8xf32> -> vector<16x8xf32>
    %cst_23 = arith.constant 0.353553385 : f32
    %32 = vector.broadcast %cst_23 : f32 to vector<16x8xf32>
    %33 = arith.mulf %31, %32 : vector<16x8xf32>
    %34 = arith.addf %33, %14 : vector<16x8xf32>
    %cst_24 = arith.constant dense<0xFF800000> : vector<16xf32>
    %35 = vector.multi_reduction <maximumf>, %34, %cst_24 [1] : vector<16x8xf32> to vector<16xf32>
    %36 = vector.shape_cast %35 : vector<16xf32> to vector<16x1xf32>
    %37 = vector.broadcast %36 : vector<16x1xf32> to vector<16x8xf32>
    %38 = arith.subf %34, %37 : vector<16x8xf32>
    %39 = math.exp %38 : vector<16x8xf32>
    %cst_25 = arith.constant dense<0.000000e+00> : vector<16xf32>
    %40 = vector.multi_reduction <add>, %39, %cst_25 [1] : vector<16x8xf32> to vector<16xf32>
    %41 = vector.shape_cast %40 : vector<16xf32> to vector<16x1xf32>
    %42 = tpu.reciprocal %41 {approx = true} : vector<16x1xf32> -> vector<16x1xf32>
    %43 = vector.broadcast %42 : vector<16x1xf32> to vector<16x8xf32>
    %44 = arith.mulf %39, %43 : vector<16x8xf32>
    %45 = vector.extract_strided_slice %26 {offsets = [0, 0], sizes = [8, 32], strides = [1, 1]} : vector<8x128xf32> to vector<8x32xf32>
    %cst_26 = arith.constant dense<0.000000e+00> : vector<16x32xf32>
    %46 = tpu.matmul %44, %45, %cst_26 {dimension_numbers = #tpu.dot_dimension_numbers<[1], [0], [0], [1], [0, 0, 1, 1], [], []>} : vector<16x8xf32>, vector<8x32xf32>, vector<16x32xf32> -> vector<16x32xf32>
    %47 = arith.addf %28, %46 : vector<16x32xf32>
    %48 = vector.extract_strided_slice %24 {offsets = [0, 8], sizes = [16, 8], strides = [1, 1]} : vector<16x32xf32> to vector<16x8xf32>
    %49 = vector.extract_strided_slice %25 {offsets = [0, 8], sizes = [8, 8], strides = [1, 1]} : vector<8x32xf32> to vector<8x8xf32>
    %cst_27 = arith.constant dense<0.000000e+00> : vector<16x8xf32>
    %50 = tpu.matmul %48, %49, %cst_27 {dimension_numbers = #tpu.dot_dimension_numbers<[1], [1], [0], [0], [0, 0, 1, 0], [], []>} : vector<16x8xf32>, vector<8x8xf32>, vector<16x8xf32> -> vector<16x8xf32>
    %cst_28 = arith.constant 0.353553385 : f32
    %51 = vector.broadcast %cst_28 : f32 to vector<16x8xf32>
    %52 = arith.mulf %50, %51 : vector<16x8xf32>
    %53 = arith.addf %52, %14 : vector<16x8xf32>
    %cst_29 = arith.constant dense<0xFF800000> : vector<16xf32>
    %54 = vector.multi_reduction <maximumf>, %53, %cst_29 [1] : vector<16x8xf32> to vector<16xf32>
    %55 = vector.shape_cast %54 : vector<16xf32> to vector<16x1xf32>
    %56 = vector.broadcast %55 : vector<16x1xf32> to vector<16x8xf32>
    %57 = arith.subf %53, %56 : vector<16x8xf32>
    %58 = math.exp %57 : vector<16x8xf32>
    %cst_30 = arith.constant dense<0.000000e+00> : vector<16xf32>
    %59 = vector.multi_reduction <add>, %58, %cst_30 [1] : vector<16x8xf32> to vector<16xf32>
    %60 = vector.shape_cast %59 : vector<16xf32> to vector<16x1xf32>
    %61 = tpu.reciprocal %60 {approx = true} : vector<16x1xf32> -> vector<16x1xf32>
    %62 = vector.broadcast %61 : vector<16x1xf32> to vector<16x8xf32>
    %63 = arith.mulf %58, %62 : vector<16x8xf32>
    %64 = vector.extract_strided_slice %26 {offsets = [0, 32], sizes = [8, 32], strides = [1, 1]} : vector<8x128xf32> to vector<8x32xf32>
    %cst_31 = arith.constant dense<0.000000e+00> : vector<16x32xf32>
    %65 = tpu.matmul %63, %64, %cst_31 {dimension_numbers = #tpu.dot_dimension_numbers<[1], [0], [0], [1], [0, 0, 1, 1], [], []>} : vector<16x8xf32>, vector<8x32xf32>, vector<16x32xf32> -> vector<16x32xf32>
    %66 = arith.addf %47, %65 : vector<16x32xf32>
    %67 = vector.extract_strided_slice %24 {offsets = [0, 16], sizes = [16, 8], strides = [1, 1]} : vector<16x32xf32> to vector<16x8xf32>
    %68 = vector.extract_strided_slice %25 {offsets = [0, 16], sizes = [8, 8], strides = [1, 1]} : vector<8x32xf32> to vector<8x8xf32>
    %cst_32 = arith.constant dense<0.000000e+00> : vector<16x8xf32>
    %69 = tpu.matmul %67, %68, %cst_32 {dimension_numbers = #tpu.dot_dimension_numbers<[1], [1], [0], [0], [0, 0, 1, 0], [], []>} : vector<16x8xf32>, vector<8x8xf32>, vector<16x8xf32> -> vector<16x8xf32>
    %cst_33 = arith.constant 0.353553385 : f32
    %70 = vector.broadcast %cst_33 : f32 to vector<16x8xf32>
    %71 = arith.mulf %69, %70 : vector<16x8xf32>
    %72 = arith.addf %71, %14 : vector<16x8xf32>
    %cst_34 = arith.constant dense<0xFF800000> : vector<16xf32>
    %73 = vector.multi_reduction <maximumf>, %72, %cst_34 [1] : vector<16x8xf32> to vector<16xf32>
    %74 = vector.shape_cast %73 : vector<16xf32> to vector<16x1xf32>
    %75 = vector.broadcast %74 : vector<16x1xf32> to vector<16x8xf32>
    %76 = arith.subf %72, %75 : vector<16x8xf32>
    %77 = math.exp %76 : vector<16x8xf32>
    %cst_35 = arith.constant dense<0.000000e+00> : vector<16xf32>
    %78 = vector.multi_reduction <add>, %77, %cst_35 [1] : vector<16x8xf32> to vector<16xf32>
    %79 = vector.shape_cast %78 : vector<16xf32> to vector<16x1xf32>
    %80 = tpu.reciprocal %79 {approx = true} : vector<16x1xf32> -> vector<16x1xf32>
    %81 = vector.broadcast %80 : vector<16x1xf32> to vector<16x8xf32>
    %82 = arith.mulf %77, %81 : vector<16x8xf32>
    %83 = vector.extract_strided_slice %26 {offsets = [0, 64], sizes = [8, 32], strides = [1, 1]} : vector<8x128xf32> to vector<8x32xf32>
    %cst_36 = arith.constant dense<0.000000e+00> : vector<16x32xf32>
    %84 = tpu.matmul %82, %83, %cst_36 {dimension_numbers = #tpu.dot_dimension_numbers<[1], [0], [0], [1], [0, 0, 1, 1], [], []>} : vector<16x8xf32>, vector<8x32xf32>, vector<16x32xf32> -> vector<16x32xf32>
    %85 = arith.addf %66, %84 : vector<16x32xf32>
    %86 = vector.extract_strided_slice %24 {offsets = [0, 24], sizes = [16, 8], strides = [1, 1]} : vector<16x32xf32> to vector<16x8xf32>
    %87 = vector.extract_strided_slice %25 {offsets = [0, 24], sizes = [8, 8], strides = [1, 1]} : vector<8x32xf32> to vector<8x8xf32>
    %cst_37 = arith.constant dense<0.000000e+00> : vector<16x8xf32>
    %88 = tpu.matmul %86, %87, %cst_37 {dimension_numbers = #tpu.dot_dimension_numbers<[1], [1], [0], [0], [0, 0, 1, 0], [], []>} : vector<16x8xf32>, vector<8x8xf32>, vector<16x8xf32> -> vector<16x8xf32>
    %cst_38 = arith.constant 0.353553385 : f32
    %89 = vector.broadcast %cst_38 : f32 to vector<16x8xf32>
    %90 = arith.mulf %88, %89 : vector<16x8xf32>
    %91 = arith.addf %90, %14 : vector<16x8xf32>
    %cst_39 = arith.constant dense<0xFF800000> : vector<16xf32>
    %92 = vector.multi_reduction <maximumf>, %91, %cst_39 [1] : vector<16x8xf32> to vector<16xf32>
    %93 = vector.shape_cast %92 : vector<16xf32> to vector<16x1xf32>
    %94 = vector.broadcast %93 : vector<16x1xf32> to vector<16x8xf32>
    %95 = arith.subf %91, %94 : vector<16x8xf32>
    %96 = math.exp %95 : vector<16x8xf32>
    %cst_40 = arith.constant dense<0.000000e+00> : vector<16xf32>
    %97 = vector.multi_reduction <add>, %96, %cst_40 [1] : vector<16x8xf32> to vector<16xf32>
    %98 = vector.shape_cast %97 : vector<16xf32> to vector<16x1xf32>
    %99 = tpu.reciprocal %98 {approx = true} : vector<16x1xf32> -> vector<16x1xf32>
    %100 = vector.broadcast %99 : vector<16x1xf32> to vector<16x8xf32>
    %101 = arith.mulf %96, %100 : vector<16x8xf32>
    %102 = vector.extract_strided_slice %26 {offsets = [0, 96], sizes = [8, 32], strides = [1, 1]} : vector<8x128xf32> to vector<8x32xf32>
    %cst_41 = arith.constant dense<0.000000e+00> : vector<16x32xf32>
    %103 = tpu.matmul %101, %102, %cst_41 {dimension_numbers = #tpu.dot_dimension_numbers<[1], [0], [0], [1], [0, 0, 1, 1], [], []>} : vector<16x8xf32>, vector<8x32xf32>, vector<16x32xf32> -> vector<16x32xf32>
    %104 = arith.addf %85, %103 : vector<16x32xf32>
    %cst_42 = arith.constant dense<0.000000e+00> : vector<16x32xf32>
    %105 = tpu.matmul %0, %11, %cst_42 {dimension_numbers = #tpu.dot_dimension_numbers<[1], [0], [0], [1], [0, 0, 1, 1], [], []>} : vector<16x32xf32>, vector<32x32xf32>, vector<16x32xf32> -> vector<16x32xf32>
    %cst_43 = arith.constant dense<0.000000e+00> : vector<16x32xf32>
    %106 = tpu.matmul %104, %12, %cst_43 {dimension_numbers = #tpu.dot_dimension_numbers<[1], [0], [0], [1], [0, 0, 1, 1], [], []>} : vector<16x32xf32>, vector<32x32xf32>, vector<16x32xf32> -> vector<16x32xf32>
    %107 = arith.addf %105, %106 : vector<16x32xf32>
    %108 = vector.broadcast %13 : vector<1x32xf32> to vector<16x32xf32>
    %109 = arith.addf %107, %108 : vector<16x32xf32>
    %110 = arith.negf %109 : vector<16x32xf32>
    %111 = math.exp %110 : vector<16x32xf32>
    %cst_44 = arith.constant 1.000000e+00 : f32
    %112 = vector.broadcast %cst_44 : f32 to vector<16x32xf32>
    %113 = arith.addf %112, %111 : vector<16x32xf32>
    %114 = arith.divf %112, %113 : vector<16x32xf32>
    %cst_45 = arith.constant 1.000000e+00 : f32
    %115 = vector.broadcast %cst_45 : f32 to vector<16x32xf32>
    %116 = arith.subf %115, %114 : vector<16x32xf32>
    %117 = arith.mulf %116, %0 : vector<16x32xf32>
    %118 = arith.mulf %114, %104 : vector<16x32xf32>
    %119 = arith.addf %117, %118 : vector<16x32xf32>
    %c0_46 = arith.constant 0 : index
    %c0_47 = arith.constant 0 : index
    %120 = vector.load %arg3[%c0_46, %c0_47] : memref<16x32xf32, #tpu.memory_space<vmem>>, vector<16x32xf32>
    tpu.vector_store %arg3[%c0_46, %c0_47], %119 {strides = array<i32>} : memref<16x32xf32, #tpu.memory_space<vmem>>, vector<16x32xf32>,
    return
  }
}

</mosaic_0001>

<bundles_post_ra>
// kernel: forward.1
= control target key start
LH: loop header
LB: loop body
LE: loop exit
PB: predicated region body
PF: predicated region fallthrough
CT: control target
= control target key end

     0   :  { %8 = vsyncpa [#allocation3], 0  ;;  %s2003_s0 = inlined_call_operand.vmem [shape: f32[16,32], index: 0, kind: input, shape index: {}]   ;;  %s2004_s1 = inlined_call_operand.vmem [shape: f32[2,16], index: 1, kind: input, shape index: {}]   ;;  %s2005_s2 = inlined_call_operand.hbm [shape: f32[288,128], index: 2, kind: input, shape index: {}]   ;;  %s2006_s3 = inlined_call_operand.hbm [shape: f32[16,32], index: 3, kind: output, shape index: {}]  }
   0x1   :  { %9 = vsyncpa [#allocation4], 0  ;;  %s1842_s12 = smov [#allocation2]   ;;  %s1794_s16 = scalar_lea.hbm %s2005_s2, 4608 }
   0x2   :  { %s19_s13 = sshll.u32 %s1842_s12, 4  ;;  %p1795_p0 = scmp.ne.s32.totalorder %s2005_s2, %s1794_s16  ;;  %s20_s13 = int_to_ptr.vmem [resolvable:$true] %s19_s13 }
   0x3   :  { %p1798_p1 = scmp.lt.u32.totalorder %s1794_s16, %s2005_s2 }
   0x5   :  { %p1800_p2 = pnand %p1798_p1, %p1795_p0 }
   0x7   :  { %1803 = shalt.err (!%p1800_p2)
}
   0x8   :  { %s1804_s21 = scalar_lea.vmem %s20_s13, 4608  ;;  %p1809_p4 = scmp.lt.s32.totalorder %s20_s13, %s20_s13 }
   0x9   :  { %p1805_p3 = scmp.ne.s32.totalorder %s20_s13, %s1804_s21  ;;  %p1810_p5 = scmp.lt.s32.totalorder %s1804_s21, %s1804_s21 }
   0xb   :  { %p1811_p6 = por %p1810_p5, %p1809_p4 }
   0xd   :  { %p1812_p7 = pnand %p1811_p6, %p1805_p3 }
   0xf   :  { %1815 = shalt.err (!%p1812_p7)
}
  0x10   :  { %s1843_s22 = smov 128   ;;  %s1844_s23 = smov 8  }
  0x11   :  { %25 = dma.hbm_to_vmem [thread:$0]  %s2005_s2, 4608, %s20_s13, [#allocation3], %s1843_s22, %s1843_s22, %s1844_s23  }
  0x12   :  { %1838 = dma.done.wait [#allocation3], 4608  }
  0x13   :  { %1839 = vsyncadd [#allocation3], 4294962688  ;;  %v1845_v0 = vmov 0.0   ;;  %vm1846_vm0 = vmmov 0   ;;  %v1847_v1 = vmov 0.0|0.0   ;;  %v34_v3 = vld [vmem:[#allocation2 + $0x10] sm:$0xff] }
  0x14   :  { %1562 = vmatprep.subr.mxu0 %v1845_v0  ;;  %1564 = vmatprep.mubr.msk.f32.mxu0 %vm1846_vm0, %v1845_v0  ;;  %v31_v2 = vld [vmem:[%s2004_s1] sm:$0x3]  ;;  %s1848_s2 = smov 16   ;;  %s1849_s28 = smov 48   ;;  %v35_v4 = vld [vmem:[#allocation2 + $0x18] sm:$0xff]  ;;  %v37_v6 = vld [vmem:[#allocation2 + $0x28] sm:$0xff] }
  0x15   :  { %1681 = vmatprep.subr.bf16.mxu1 %v1847_v1  ;;  %1583 = vmatprep.mubr.msk.f32.mxu1 %vm1846_vm0, %v1845_v0  ;;  %v36_v5 = vld [vmem:[#allocation2 + $0x20] sm:$0xff]  ;;  %v1682_v7 = vpack.c.bf16 %v35_v4, %v34_v3  ;;  %s1850_s29 = smov 32   ;;  %v38_v9 = vld [vmem:[#allocation2 + $0x30] sm:$0xff]  ;;  %v39_v10 = vld [vmem:[#allocation2 + $0x38] sm:$0xff]  ;;  %vm78_vm1 = vcmask 130048   ;;  %vm80_vm2 = vcmask 261120  }
  0x16   :  { %69 = vrot.lane.b32.xlu0 %v31_v2, %s1848_s2  ;;  %75 = vrot.lane.b32.xlu1 %v31_v2, %s1849_s28  ;;  %v1685_v8 = vpack.c.bf16 %v37_v6, %v36_v5  ;;  %v1688_v11 = vpack.c.bf16 %v39_v10, %v38_v9  ;;  %vm82_vm3 = vcmask 392192   ;;  %vm88_vm4 = vcmask 1041408   ;;  %v32_v17 = vld [vmem:[#allocation2] sm:$0xff]  ;;  %v41_v20 = vld [vmem:[#allocation2 + $0x48] sm:$0xff]  ;;  %v43_v22 = vld [vmem:[#allocation2 + $0x58] sm:$0xff]  ;;  %s1852_s6 = smov 112  }
  0x17   :  { %1683 = vmatpush3.bf16.msra.mxu1 %v1682_v7  ;;  %vm84_vm5 = vcmask 15360   ;;  %v40_v19 = vld [vmem:[#allocation2 + $0x40] sm:$0xff]  ;;  %v45_v24 = vld [vmem:[#allocation2 + $0x68] sm:$0xff]  ;;  %v46_v26 = vld [vmem:[#allocation2 + $0x70] sm:$0xff]  ;;  %vm163_vm6 = vcmask 523264   ;;  %vm470_vm7 = vcmask 64512  }
  0x18   :  { %1684 = vmatprep.subr.bf16.mxu1 %v1847_v1  ;;  %v1691_v21 = vpack.c.bf16 %v41_v20, %v40_v19  ;;  %v44_v23 = vld [vmem:[#allocation2 + $0x60] sm:$0xff]  ;;  %v1697_v28 = vpack.c.bf16 %v46_v26, %v45_v24  ;;  %v49_v30 = vld [vmem:[#allocation2 + $0x88] sm:$0xff]  ;;  %v50_v37 = vld [vmem:[#allocation2 + $0x90] sm:$0xff]  ;;  %s1853_s7 = smov 104   ;;  %s1854_s8 = smov 96  }
  0x19   :  { %v1693_v25 = vpack.c.bf16 %v44_v23, %v43_v22  ;;  %v1909_v27 = vld [vmem:[%s2003_s0] sm:$0xff]  ;;  %v1916_v31 = vld [vmem:[%s2003_s0 + $0x8] sm:$0xff]  ;;  %v51_v38 = vld [vmem:[#allocation2 + $0x98] sm:$0xff]  ;;  %s1851_s0 = smov 120   ;;  %s1855_s9 = smov 64  }
  0x1a   :  { %72 = vrot.lane.b32.xlu0 %v31_v2, %s1850_s29  ;;  %v48_v29 = vld [vmem:[#allocation2 + $0x80] sm:$0xff]  ;;  %v33_v33 = vld [vmem:[#allocation2 + $0x8] sm:$0xff]  ;;  %v1705_v39 = vpack.c.bf16 %v51_v38, %v50_v37  ;;  %v1466_v41 = vld [vmem:[#allocation2 + $0x78] ss:$0 sm:$0xff]  ;;  %s1856_s10 = smov [#allocation5]  }
  0x1b   :  { %1686 = vmatpush3.bf16.msra.mxu1 %v1685_v8  ;;  %v1702_v32 = vpack.c.bf16 %v49_v30, %v48_v29  ;;  %v42_v45 = vld [vmem:[#allocation2 + $0x50] sm:$0xff]  ;;  %v52_v46 = vld [vmem:[#allocation2 + $0xa0] sm:$0xff]  ;;  %v53_v47 = vld [vmem:[#allocation2 + $0xa8] sm:$0xff]  ;;  %s1451_s11 = sshll.u32 %s1856_s10, 4  ;;  %s1452_s11 = int_to_ptr.vmem [resolvable:$true] %s1451_s11 }
  0x1c   :  { %1687 = vmatprep.subr.bf16.mxu1 %v1847_v1  ;;  %v1708_v51 = vpack.c.bf16 %v53_v47, %v52_v46  ;;  %v54_v53 = vld [vmem:[#allocation2 + $0xb0] sm:$0xff]  ;;  %v55_v54 = vld [vmem:[#allocation2 + $0xb8] sm:$0xff]  ;;  %s1816_s12 = scalar_lea.vmem %s1452_s11, 256  ;;  %p1821_p9 = scmp.lt.s32.totalorder %s1452_s11, %s1452_s11 }
  0x1d   :  { %v1711_v55 = vpack.c.bf16 %v55_v54, %v54_v53  ;;  %v67_v6 = vld [vmem:[#allocation2 + $0x118] sm:$0xff]  ;;  %v66_v9 = vld [vmem:[#allocation2 + $0x110] sm:$0xff]  ;;  %p1817_p8 = scmp.ne.s32.totalorder %s1452_s11, %s1816_s12  ;;  %p1822_p10 = scmp.lt.s32.totalorder %s1816_s12, %s1816_s12 }
  0x1f   :  { %1689 = vmatpush3.bf16.msra.mxu1 %v1688_v11  ;;  %p1823_p11 = por %p1822_p10, %p1821_p9 }
  0x20   :  { %1690 = vmatprep.subr.bf16.mxu1 %v1847_v1 }
  0x21   :  { %p1824_p12 = pnand %p1823_p11, %p1817_p8 }
  0x23   :  { %1692 = vmatpush3.bf16.msra.mxu1 %v1691_v21 }
  0x88   :  { %v70_v12 = vpop.permute.xlu0 %69  ;;  %v76_v13 = vpop.permute.xlu1 %75 }
  0x89   :  { %v79_v14 = vsel %vm78_vm1, %v31_v2, %v70_v12 }
  0x8c   :  { %v73_v15 = vpop.permute.xlu0 %72 }
  0x8d   :  { %v81_v16 = vsel %vm80_vm2, %v79_v14, %v73_v15 }
  0x8e   :  { %v83_v18 = vsel %vm82_vm3, %v81_v16, %v76_v13 }
  0x8f   :  { %1563 = vmatpush3.msk.msra.mxu0 %vm88_vm4, %v83_v18 }
  0x90   :  { %1565 = vmatmul.mubr.msk.f32.vlgmr.msra.gmra.mrb[0].mxu0 %vm84_vm5, %v32_v17  ;;  %1694 = vmatprep.subr.bf16.mxu0 %v1693_v25 }
  0x91   :  { %1594 = vmatprep.mubr.msk.f32.mxu0 %vm80_vm2, %v1909_v27  ;;  %1696 = vmatpush3.bf16.msra.mxu0 %v1693_v25 }
  0x92   :  { %1698 = vmatprep.subr.bf16.mxu0 %v1697_v28 }
  0x95   :  { %1700 = vmatpush3.bf16.msra.mxu0 %v1697_v28 }
  0x96   :  { %1701 = vmatprep.subr.bf16.mxu0 %v1847_v1 }
  0x98   :  { %1595 = vmatmul.mubr.msk.f32.vlgmr.msra.gmra.mrb[2].mxu0 %vm80_vm2, %v1916_v31 }
  0x99   :  { %1703 = vmatpush3.bf16.msra.mxu0 %v1702_v32  ;;  %1605 = vmatprep.mubr.msk.f32.mxu0 %vm1846_vm0, %v1845_v0 }
  0x9a   :  { %1704 = vmatprep.subr.bf16.mxu0 %v1847_v1 }
  0x9d   :  { %1706 = vmatpush3.bf16.msra.mxu0 %v1705_v39 }
  0x9e   :  { %1707 = vmatprep.subr.bf16.mxu0 %v1847_v1 }
 0x163   :  { %v158_v34 = vpop.f32.mrb[0].mxu0 }
 0x164   :  { %v162_v35 = vmul.f32 %v158_v34, %v33_v33  ;;  %v1566_v36 = vpop.f32.mrb[1].mxu0 }
 0x166   :  { %1584 = vmatmul.mubr.msk.f32.vlgmr.msra.gmra.mrb[0].mxu1 %vm163_vm6, %v162_v35 }
 0x16b   :  { %v1596_v40 = vpop.f32.mrb[2].mxu0 }
 0x16c   :  { %v320_v42 = vadd.f32 %v1596_v40, %v1466_v41  ;;  %v314_v43 = vpop.f32.mrb[3].mxu0 }
 0x16d   :  { %v315_v44 = vadd.f32 %v1466_v41, %v314_v43 }
 0x16f   :  { %664 = vrot.lane.b32.xlu0 %v315_v44, %s1851_s0 }
 0x1e1   :  { %v665_v56 = vpop.permute.xlu0 %664 }
 0x1e2   :  { %1631 = vmatprep.mubr.msk.f32.mxu1 %vm470_vm7, %v665_v56 }
 0x239   :  { %v233_v48 = vpop.f32.mrb[0].mxu1 }
 0x23a   :  { %v234_v49 = vadd.f32 %v233_v48, %v42_v45  ;;  %v1585_v50 = vpop.f32.mrb[1].mxu1 }
 0x23c   :  { %v237_v52 = vmax.f32 %v234_v49, 0.0 }
 0x23e   :  { %1606 = vmatmul.mubr.msk.f32.vlgmr.msra.gmra.mrb[4].mxu0 %vm80_vm2, %v237_v52 }
 0x23f   :  { %1709 = vmatpush3.bf16.msra.mxu0 %v1708_v51  ;;  %1616 = vmatprep.mubr.msk.f32.mxu0 %vm1846_vm0, %v1845_v0 }
 0x240   :  { %1710 = vmatprep.subr.bf16.mxu0 %v1847_v1 }
 0x243   :  { %1712 = vmatpush3.bf16.msra.mxu0 %v1711_v55 }
 0x246   :  { %1617 = vmatmul.mubr.msk.f32.vlgmr.msra.gmra.mrb[6].mxu0 %vm80_vm2, %v237_v52 }
 0x247   :  { %1621 = vmatprep.mubr.msk.f32.mxu0 %vm470_vm7, %v315_v44 }
 0x311   :  { %v392_v57 = vpop.f32.mrb[4].mxu0 }
 0x312   :  { %668 = vrot.lane.b32.xlu1 %v392_v57, %s1851_s0  ;;  %v1607_v58 = vpop.f32.mrb[5].mxu0  ;;  %1619 = vmatprep.subr.msk.mxu0 %vm470_vm7, %v392_v57 }
 0x313   :  { %868 = vrot.lane.b32.xlu0 %v392_v57, %s1852_s6  ;;  %1620 = vmatpush3.xpose.msk.msra.mxu0 %vm470_vm7, %v392_v57 }
 0x316   :  { %666 = vrot.lane.b32.xlu1 %v320_v42, %s1851_s0  ;;  %1622 = vmatmul.mubr.msk.f32.vlgmr.msra.gmra.mrb[8].mxu0 %vm470_vm7, %v320_v42 }
 0x317   :  { %866 = vrot.lane.b32.xlu0 %v320_v42, %s1852_s6 }
 0x319   :  { %v1935_v59 = vpop.f32.mrb[6].mxu0 }
 0x31a   :  { %v1618_v60 = vpop.f32.mrb[7].mxu0  ;;  %1624 = vmatprep.subr.mxu0 %v1935_v59  ;;  %864 = vrot.lane.b32.xlu1 %v315_v44, %s1852_s6 }
 0x31b   :  { %1063 = vrot.lane.b32.xlu0 %v315_v44, %s1853_s7  ;;  %1625 = vmatpush3.msra.mxu0 %v1935_v59 }
 0x31e   :  { %1067 = vrot.lane.b32.xlu1 %v392_v57, %s1853_s7 }
 0x322   :  { %1065 = vrot.lane.b32.xlu1 %v320_v42, %s1853_s7 }
 0x384   :  { %v669_v61 = vpop.permute.xlu1 %668 }
 0x385   :  { %v869_v62 = vpop.permute.xlu0 %868  ;;  %1629 = vmatprep.subr.msk.mxu1 %vm470_vm7, %v669_v61 }
 0x386   :  { %1630 = vmatpush3.xpose.msk.msra.mxu1 %vm470_vm7, %v669_v61 }
 0x387   :  { %1639 = vmatprep.subr.msk.mxu1 %vm470_vm7, %v869_v62 }
 0x388   :  { %v667_v63 = vpop.permute.xlu1 %666 }
 0x389   :  { %v867_v0 = vpop.permute.xlu0 %866  ;;  %1632 = vmatmul.mubr.msk.f32.vlgmr.msra.gmra.mrb[2].mxu1 %vm470_vm7, %v667_v63 }
 0x38a   :  { %1640 = vmatpush3.xpose.msk.msra.mxu1 %vm470_vm7, %v869_v62 }
 0x38c   :  { %v865_v1 = vpop.permute.xlu1 %864 }
 0x38d   :  { %1641 = vmatprep.mubr.msk.f32.mxu1 %vm470_vm7, %v865_v1  ;;  %v1064_v2 = vpop.permute.xlu0 %1063 }
 0x38e   :  { %1642 = vmatmul.mubr.msk.f32.vlgmr.msra.gmra.mrb[4].mxu1 %vm470_vm7, %v867_v0 }
 0x38f   :  { %1651 = vmatprep.mubr.msk.f32.mxu1 %vm470_vm7, %v1064_v2 }
 0x390   :  { %v1068_v3 = vpop.permute.xlu1 %1067 }
 0x391   :  { %1649 = vmatprep.subr.msk.mxu1 %vm470_vm7, %v1068_v3 }
 0x392   :  { %1650 = vmatpush3.xpose.msk.msra.mxu1 %vm470_vm7, %v1068_v3 }
 0x394   :  { %v1066_v4 = vpop.permute.xlu1 %1065 }
 0x395   :  { %1652 = vmatmul.mubr.msk.f32.vlgmr.msra.gmra.mrb[6].mxu1 %vm470_vm7, %v1066_v4 }
 0x3e9   :  { %v1623_v5 = vpop.f32.mrb[8].mxu0 }
 0x3ea   :  { %v556_v7 = vmul.f32 0.35355338, %v1623_v5  ;;  %v546_v8 = vpop.f32.mrb[9].mxu0 }
 0x3eb   :  { %v555_v10 = vmul.f32 0.35355338, %v546_v8 }
 0x3ec   :  { %v558_v11 = vadd.f32 %v556_v7, %v67_v6 }
 0x3ed   :  { %v557_v12 = vadd.f32 %v555_v10, %v66_v9 }
 0x3ee   :  { %v562_v13 = vsel %vm470_vm7, %v558_v11, -inf }
 0x3ef   :  { %563 = vmax.xlane.f32.xlu1 %v562_v13  ;;  %v559_v14 = vsel %vm470_vm7, %v557_v12, -inf }
 0x3f0   :  { %560 = vmax.xlane.f32.xlu0 %v559_v14 }
 0x45c   :  { %v1633_v15 = vpop.f32.mrb[2].mxu1 }
 0x45d   :  { %v742_v16 = vpop.f32.mrb[3].mxu1  ;;  %v752_v17 = vmul.f32 0.35355338, %v1633_v15 }
 0x45e   :  { %v751_v18 = vmul.f32 0.35355338, %v742_v16 }
 0x45f   :  { %v754_v24 = vadd.f32 %v752_v17, %v67_v6 }
 0x460   :  { %v753_v19 = vadd.f32 %v751_v18, %v66_v9 }
 0x461   :  { %v1643_v20 = vpop.f32.mrb[4].mxu1  ;;  %v758_v28 = vsel %vm470_vm7, %v754_v24, -inf }
 0x462   :  { %v952_v21 = vmul.f32 0.35355338, %v1643_v20  ;;  %v942_v22 = vpop.f32.mrb[5].mxu1  ;;  %v755_v23 = vsel %vm470_vm7, %v753_v19, -inf }
 0x463   :  { %v951_v25 = vmul.f32 0.35355338, %v942_v22  ;;  %756 = vmax.xlane.f32.xlu0 %v755_v23 }
 0x464   :  { %v954_v29 = vadd.f32 %v952_v21, %v67_v6 }
 0x465   :  { %v953_v26 = vadd.f32 %v951_v25, %v66_v9  ;;  %v61_v25 = vld [vmem:[#allocation2 + $0xe8] sm:$0xff] }
 0x466   :  { %v958_v36 = vsel %vm470_vm7, %v954_v29, -inf }
 0x467   :  { %759 = vmax.xlane.f32.xlu0 %v758_v28  ;;  %v955_v30 = vsel %vm470_vm7, %v953_v26, -inf }
 0x468   :  { %v1653_v32 = vpop.f32.mrb[6].mxu1  ;;  %956 = vmax.xlane.f32.xlu1 %v955_v30 }
 0x469   :  { %v1151_v33 = vmul.f32 0.35355338, %v1653_v32  ;;  %v1141_v34 = vpop.f32.mrb[7].mxu1 }
 0x46a   :  { %v1150_v35 = vmul.f32 0.35355338, %v1141_v34 }
 0x46b   :  { %959 = vmax.xlane.f32.xlu0 %v958_v36  ;;  %v1153_v37 = vadd.f32 %v1151_v33, %v67_v6 }
 0x46c   :  { %v1152_v38 = vadd.f32 %v1150_v35, %v66_v9 }
 0x46d   :  { %v1157_v39 = vsel %vm470_vm7, %v1153_v37, -inf }
 0x46e   :  { %v1154_v40 = vsel %vm470_vm7, %v1152_v38, -inf }
 0x46f   :  { %1155 = vmax.xlane.f32.xlu1 %v1154_v40  ;;  %1158 = vmax.xlane.f32.xlu0 %v1157_v39 }
 0x47c   :  { %v564_v41 = vpop.xlane.xlu1 %563 }
 0x47d   :  { %v566_v42 = vsub.f32 %v558_v11, %v564_v41  ;;  %v561_v43 = vpop.xlane.xlu0 %560 }
 0x47e   :  { %v565_v44 = vsub.f32 %v557_v12, %v561_v43 }
 0x47f   :  { %v569_v45 = vmul.f32 1.442695, %v566_v42 }
 0x480   :  { %v567_v46 = vmul.f32 1.442695, %v565_v44 }
 0x481   :  { %1754 = vpow2.f32 %v569_v45 }
 0x482   :  { %1756 = vpow2.f32 %v567_v46 }
 0x48b   :  { %v1755_v47 = vpop.eup %1754 }
 0x48c   :  { %v1757_v48 = vpop.eup %1756  ;;  %v574_v49 = vsel %vm470_vm7, %v1755_v47, 0.0 }
 0x48d   :  { %575 = vadd.xlane.f32.xlu0 %v574_v49  ;;  %v571_v50 = vsel %vm470_vm7, %v1757_v48, 0.0  ;;  %v63_v49 = vld [vmem:[#allocation2 + $0xf8] sm:$0xff] }
 0x48e   :  { %572 = vadd.xlane.f32.xlu1 %v571_v50  ;;  %v64_v50 = vld [vmem:[#allocation2 + $0x100] sm:$0xff] }
 0x49f   :  { %778 = vrot.lane.b32.xlu1 %v1935_v59, %s1854_s8 }
 0x4f0   :  { %v757_v51 = vpop.xlane.xlu0 %756 }
 0x4f1   :  { %v761_v52 = vsub.f32 %v753_v19, %v757_v51  ;;  %v1717_v51 = vpack.c.bf16 %v64_v50, %v63_v49 }
 0x4f3   :  { %v763_v53 = vmul.f32 1.442695, %v761_v52  ;;  %v57_v52 = vld [vmem:[#allocation2 + $0xc8] sm:$0xff] }
 0x4f4   :  { %v760_v54 = vpop.xlane.xlu0 %759 }
 0x4f5   :  { %1758 = vpow2.f32 %v763_v53  ;;  %v762_v55 = vsub.f32 %v754_v24, %v760_v54  ;;  %v957_v56 = vpop.xlane.xlu1 %956  ;;  %v58_v53 = vld [vmem:[#allocation2 + $0xd0] sm:$0xff] }
 0x4f6   :  { %v961_v57 = vsub.f32 %v953_v26, %v957_v56  ;;  %v62_v26 = vld [vmem:[#allocation2 + $0xf0] sm:$0xff]  ;;  %v1721_v54 = vpack.c.bf16 %v58_v53, %v57_v52 }
 0x4f7   :  { %v765_v58 = vmul.f32 1.442695, %v762_v55  ;;  %v1713_v28 = vpack.c.bf16 %v62_v26, %v61_v25  ;;  %v1471_v55 = vld [vmem:[#allocation2 + $0xc0] ss:$0 sm:$0xff] }
 0x4f8   :  { %v963_v60 = vmul.f32 1.442695, %v961_v57  ;;  %v960_v61 = vpop.xlane.xlu0 %959  ;;  %v59_v57 = vld [vmem:[#allocation2 + $0xd8] sm:$0xff] }
 0x4f9   :  { %1760 = vpow2.f32 %v765_v58  ;;  %v962_v62 = vsub.f32 %v954_v29, %v960_v61  ;;  %1714 = vmatprep.subr.bf16.mxu1 %v1713_v28  ;;  %v60_v58 = vld [vmem:[#allocation2 + $0xe0] sm:$0xff] }
 0x4fa   :  { %1762 = vpow2.f32 %v963_v60  ;;  %1716 = vmatpush3.bf16.msra.mxu1 %v1713_v28 }
 0x4fb   :  { %v965_v63 = vmul.f32 1.442695, %v962_v62  ;;  %1718 = vmatprep.subr.bf16.mxu1 %v1717_v51 }
 0x4fc   :  { %v1156_v0 = vpop.xlane.xlu1 %1155  ;;  %v1159_v1 = vpop.xlane.xlu0 %1158 }
 0x4fd   :  { %1764 = vpow2.f32 %v965_v63  ;;  %v1160_v2 = vsub.f32 %v1152_v38, %v1156_v0  ;;  %v1161_v3 = vsub.f32 %v1153_v37, %v1159_v1  ;;  %v1725_v63 = vpack.c.bf16 %v60_v58, %v59_v57  ;;  %v1496_v0 = vld [vmem:[#allocation2 + $0x108] ss:$0 sm:$0xff] }
 0x4fe   :  { %1720 = vmatpush3.bf16.msra.mxu1 %v1717_v51 }
 0x4ff   :  { %v1759_v4 = vpop.eup %1758  ;;  %v1162_v5 = vmul.f32 1.442695, %v1160_v2  ;;  %v1164_v6 = vmul.f32 1.442695, %v1161_v3  ;;  %1722 = vmatprep.subr.bf16.mxu1 %v1721_v54 }
 0x500   :  { %v767_v7 = vsel %vm470_vm7, %v1759_v4, 0.0 }
 0x501   :  { %1766 = vpow2.f32 %v1162_v5  ;;  %768 = vadd.xlane.f32.xlu1 %v767_v7 }
 0x502   :  { %1768 = vpow2.f32 %v1164_v6 }
 0x503   :  { %v1761_v8 = vpop.eup %1760 }
 0x504   :  { %v1763_v9 = vpop.eup %1762  ;;  %v770_v10 = vsel %vm470_vm7, %v1761_v8, 0.0 }
 0x505   :  { %771 = vadd.xlane.f32.xlu0 %v770_v10  ;;  %v967_v11 = vsel %vm470_vm7, %v1763_v9, 0.0 }
 0x506   :  { %968 = vadd.xlane.f32.xlu1 %v967_v11 }
 0x507   :  { %v1765_v12 = vpop.eup %1764 }
 0x508   :  { %v970_v13 = vsel %vm470_vm7, %v1765_v12, 0.0 }
 0x509   :  { %971 = vadd.xlane.f32.xlu0 %v970_v13 }
 0x50b   :  { %v1767_v14 = vpop.eup %1766 }
 0x50c   :  { %v1769_v15 = vpop.eup %1768  ;;  %v1166_v16 = vsel %vm470_vm7, %v1767_v14, 0.0 }
 0x50d   :  { %1167 = vadd.xlane.f32.xlu1 %v1166_v16  ;;  %v1169_v17 = vsel %vm470_vm7, %v1769_v15, 0.0 }
 0x50e   :  { %1170 = vadd.xlane.f32.xlu0 %v1169_v17 }
 0x51a   :  { %v576_v18 = vpop.xlane.xlu0 %575 }
 0x51b   :  { %1770 = vrcp.f32 %v576_v18  ;;  %v573_v19 = vpop.xlane.xlu1 %572 }
 0x51c   :  { %1772 = vrcp.f32 %v573_v19 }
 0x51e   :  { %1176 = vrot.lane.b32.xlu1 %v1935_v59, %s1850_s29 }
 0x51f   :  { %v779_v20 = vpop.permute.xlu1 %778 }
 0x520   :  { %1634 = vmatprep.subr.mxu0 %v779_v20 }
 0x524   :  { %977 = vrot.lane.b32.xlu0 %v1935_v59, %s1855_s9 }
 0x525   :  { %v1771_v21 = vpop.eup %1770 }
 0x526   :  { %v1773_v22 = vpop.eup %1772  ;;  %v580_v24 = vmul.f32 %v1771_v21, %v1755_v47 }
 0x527   :  { %v579_v23 = vmul.f32 %v1773_v22, %v1757_v48 }
 0x529   :  { %1626 = vmatprep.mubr.msk.f32.mxu0 %vm470_vm7, %v579_v23 }
 0x52a   :  { %1627 = vmatmul.mubr.msk.f32.vlgmr.msra.gmra.mrb[10].mxu0 %vm470_vm7, %v580_v24 }
 0x52b   :  { %1635 = vmatpush3.msra.mxu0 %v779_v20 }
 0x58e   :  { %v769_v29 = vpop.xlane.xlu1 %768 }
 0x58f   :  { %1774 = vrcp.f32 %v769_v29 }
 0x592   :  { %v772_v30 = vpop.xlane.xlu0 %771 }
 0x593   :  { %1776 = vrcp.f32 %v772_v30  ;;  %v969_v32 = vpop.xlane.xlu1 %968 }
 0x594   :  { %1778 = vrcp.f32 %v969_v32 }
 0x596   :  { %v972_v59 = vpop.xlane.xlu0 %971 }
 0x597   :  { %1780 = vrcp.f32 %v972_v59 }
 0x599   :  { %v1775_v33 = vpop.eup %1774 }
 0x59a   :  { %v1168_v34 = vpop.xlane.xlu1 %1167  ;;  %v775_v35 = vmul.f32 %v1775_v33, %v1759_v4 }
 0x59b   :  { %1782 = vrcp.f32 %v1168_v34  ;;  %v1171_v36 = vpop.xlane.xlu0 %1170 }
 0x59c   :  { %1636 = vmatprep.mubr.msk.f32.mxu0 %vm470_vm7, %v775_v35  ;;  %1784 = vrcp.f32 %v1171_v36 }
 0x59d   :  { %v1777_v37 = vpop.eup %1776 }
 0x59e   :  { %v1779_v38 = vpop.eup %1778  ;;  %v776_v39 = vmul.f32 %v1777_v37, %v1761_v8  ;;  %v1177_v42 = vpop.permute.xlu1 %1176 }
 0x59f   :  { %v978_v40 = vpop.permute.xlu0 %977  ;;  %v975_v41 = vmul.f32 %v1779_v38, %v1763_v9 }
 0x5a0   :  { %1644 = vmatprep.subr.mxu0 %v978_v40  ;;  %1637 = vmatmul.mubr.msk.f32.vlgmr.msra.gmra.mrb[10].mxu0 %vm470_vm7, %v776_v39 }
 0x5a1   :  { %1645 = vmatpush3.msra.mxu0 %v978_v40  ;;  %1646 = vmatprep.mubr.msk.f32.mxu0 %vm470_vm7, %v975_v41  ;;  %v1781_v43 = vpop.eup %1780 }
 0x5a2   :  { %1654 = vmatprep.subr.mxu0 %v1177_v42  ;;  %v976_v45 = vmul.f32 %v1781_v43, %v1765_v12 }
 0x5a5   :  { %v1783_v44 = vpop.eup %1782 }
 0x5a6   :  { %v1174_v46 = vmul.f32 %v1783_v44, %v1767_v14  ;;  %v1785_v47 = vpop.eup %1784 }
 0x5a7   :  { %v1175_v48 = vmul.f32 %v1785_v47, %v1769_v15 }
 0x5a8   :  { %1647 = vmatmul.mubr.msk.f32.vlgmr.msra.gmra.mrb[10].mxu0 %vm470_vm7, %v976_v45 }
 0x5a9   :  { %1655 = vmatpush3.msra.mxu0 %v1177_v42  ;;  %1656 = vmatprep.mubr.msk.f32.mxu0 %vm470_vm7, %v1174_v46 }
 0x5b0   :  { %1657 = vmatmul.mubr.msk.f32.vlgmr.msra.gmra.mrb[10].mxu0 %vm470_vm7, %v1175_v48 }
 0x683   :  { %v1658_v56 = vpop.f32.mrb[10].mxu0 }
 0x684   :  { %v1251_v60 = vpop.f32.mrb[11].mxu0  ;;  %v1729_v62 = vadd.f32 %v1658_v56, %v1471_v55 }
 0x685   :  { %v1730_v61 = vadd.f32 %v1471_v55, %v1251_v60 }
 0x687   :  { %1667 = vmatprep.mubr.msk.f32.mxu1 %vm80_vm2, %v1730_v61 }
 0x688   :  { %1668 = vmatmul.mubr.msk.f32.vlgmr.msra.gmra.mrb[8].mxu1 %vm80_vm2, %v1729_v62 }
 0x689   :  { %1724 = vmatpush3.bf16.msra.mxu1 %v1721_v54  ;;  %1678 = vmatprep.mubr.msk.f32.mxu1 %vm80_vm2, %v1909_v27 }
 0x68a   :  { %1726 = vmatprep.subr.bf16.mxu1 %v1725_v63 }
 0x68d   :  { %1728 = vmatpush3.bf16.msra.mxu1 %v1725_v63 }
 0x690   :  { %1679 = vmatmul.mubr.msk.f32.vlgmr.msra.gmra.mrb[8].mxu1 %vm80_vm2, %v1916_v31 }
 0x763   :  { %v1680_v1 = vpop.f32.mrb[8].mxu1 }
 0x764   :  { %v1423_v2 = vadd.f32 %v1680_v1, %v1496_v0  ;;  %v1409_v3 = vpop.f32.mrb[9].mxu1 }
 0x765   :  { %v1422_v4 = vadd.f32 %v1496_v0, %v1409_v3 }
 0x766   :  { %v1498_v5 = vmul.f32 -1.442695, %v1423_v2 }
 0x767   :  { %v1497_v6 = vmul.f32 -1.442695, %v1422_v4 }
 0x768   :  { %1786 = vpow2.f32 %v1498_v5 }
 0x769   :  { %1788 = vpow2.f32 %v1497_v6 }
 0x772   :  { %v1787_v7 = vpop.eup %1786 }
 0x773   :  { %v1789_v8 = vpop.eup %1788  ;;  %v1431_v9 = vadd.f32 1.0, %v1787_v7 }
 0x774   :  { %v1430_v10 = vadd.f32 1.0, %v1789_v8 }
 0x775   :  { %1790 = vrcp.f32 %v1431_v9 }
 0x776   :  { %1792 = vrcp.f32 %v1430_v10 }
 0x77f   :  { %v1791_v11 = vpop.eup %1790 }
 0x780   :  { %v1793_v12 = vpop.eup %1792  ;;  %v1437_v13 = vsub.f32 1.0, %v1791_v11  ;;  %v1441_v16 = vmul.f32 %v1791_v11, %v1729_v62 }
 0x781   :  { %v1436_v14 = vsub.f32 1.0, %v1793_v12  ;;  %v1440_v18 = vmul.f32 %v1793_v12, %v1730_v61 }
 0x782   :  { %v1439_v15 = vmul.f32 %v1437_v13, %v1916_v31 }
 0x783   :  { %v1438_v17 = vmul.f32 %v1436_v14, %v1909_v27 }
 0x784   :  { %v1443_v19 = vadd.f32 %v1441_v16, %v1439_v15 }
 0x785   :  { %v1442_v20 = vadd.f32 %v1440_v18, %v1438_v17 }
 0x786   :  { %1445 = vst.msk [vmem:[#allocation5 + $0x8] sm:$0xff] %vm80_vm2, %v1443_v19 }
 0x787   :  { %1444 = vst.msk [vmem:[#allocation5] sm:$0xff] %vm80_vm2, %v1442_v20 }
 0x788   :  { %1827 = shalt.err (!%p1824_p12)
}
 0x789   :  { %s1828_s15 = scalar_lea.hbm %s2006_s3, 256 }
 0x78a   :  { %p1829_p13 = scmp.ne.s32.totalorder %s2006_s3, %s1828_s15  ;;  %p1832_p0 = scmp.lt.u32.totalorder %s1828_s15, %s2006_s3 }
 0x78c   :  { %p1834_p1 = pnand %p1832_p0, %p1829_p13 }
 0x78e   :  { %1837 = shalt.err (!%p1834_p1)
}
 0x78f   :  { %1457 = dma.vmem_to_hbm [thread:$0]  %s1452_s11, 256, %s2006_s3, [#allocation4], %s1843_s22, %s1843_s22, %s1844_s23  }
 0x790   :  { %1840 = dma.done.wait [#allocation4], 256  }
 0x791   :  { %1841 = vsyncadd [#allocation4], 4294967040 }
 0x792   :  { %1461 = vsyncpa [#allocation3], 1 }
 0x793   :  { %1462 = vsyncpa [#allocation4], 1 }

</bundles_post_ra>
